<compile_context>
chip_gen: v6e
topology: v6e:2x2x1
jax: 0.10.0
libtpu: 0.0.40
codegen_flags: <defaults>
</compile_context>

<pallas_src>
import jax
import jax.numpy as jnp
from jax.experimental import pallas as pl
from jax.experimental.pallas import tpu as pltpu


def _round_up(n, m):
    return (n + m - 1) // m * m


def _cdiv(a, b):
    return -(-a // b)


def _vmem_capacity_bytes():
    try:
        info = pltpu.get_tpu_info()
        cap = getattr(info, "vmem_capacity_bytes", None)
        if cap:
            return int(cap)
    except Exception:
        pass
    return 64 * 1024 * 1024  # conservative default (v7x per-TC)


def _choose_tile_b(B, bound_tb, min_tiles=2):
    """Largest multiple of 8 dividing round_up(B,8), <= VMEM bound, preferring
    to leave at least `min_tiles` batch tiles (v7x megacore / pipelining)."""
    B8 = _round_up(max(B, 1), 8)
    bound_tb = max(8, min(bound_tb, B8))
    cands = [c for c in range(8, B8 + 1, 8) if B8 % c == 0 and c <= bound_tb]
    if not cands:
        return 8
    good = [c for c in cands if B8 // c >= min_tiles]
    return max(good) if good else max(cands)


def resnet_decoder(x, weight, bias, *, vmem_budget_bytes=None):
    """
    x:      (B, C, H, W)    NCHW, like the PyTorch module
    weight: (n_classes, C)  PyTorch nn.Linear layout
    bias:   (n_classes,)
    returns (B, n_classes) in x.dtype
    """
    B, C, H, W = x.shape
    N = weight.shape[0]
    HW = H * W

    # Free view: contiguous NCHW -> (B, C, HW).  No extra HBM traffic.
    x_flat = x.reshape(B, C, HW)

    # Params in x.dtype (bf16 stays bf16), lane-padded n_classes.
    N_pad = _round_up(N, 128)
    p_dtype = x.dtype
    w_t = jnp.zeros((C, N_pad), p_dtype).at[:, :N].set(weight.T.astype(p_dtype))
    b2d = jnp.zeros((1, N_pad), p_dtype).at[:, :N].set(bias.astype(p_dtype))

    x_isz = jnp.dtype(x.dtype).itemsize
    o_isz = x_isz
    sub_x = max(8, 32 // x_isz)  # min sublane multiple for this dtype

    # ---- VMEM budget / limit, per generation --------------------------------
    cap = _vmem_capacity_bytes()
    if vmem_budget_bytes is None:
        vmem_budget_bytes = min(int(0.75 * cap), 96 * 1024 * 1024)
    vmem_budget_bytes = min(vmem_budget_bytes, int(0.85 * cap))

    # weight + bias are single-buffered (constant blocks)
    resident = (_round_up(C, sub_x) * N_pad * x_isz
                + sub_x * N_pad * x_isz)
    avail = max(0, vmem_budget_bytes - resident)

    def tile_bytes(tb, hwb):
        x_t = tb * _round_up(C, sub_x) * _round_up(hwb, 128) * x_isz   # x (2 bufs)
        o_t = _round_up(tb, sub_x) * N_pad * o_isz                     # out (2 bufs)
        acc = _round_up(tb, 8) * _round_up(C, 128) * 4                 # f32 acc
        return 2 * x_t + 2 * o_t + acc

    # ---- spatial (HW) block: full HW if a minimal tile fits, else 128-chunks --
    if tile_bytes(8, HW) <= avail:
        hw_block = HW
    else:
        fixed8 = 2 * _round_up(8, sub_x) * N_pad * o_isz + 8 * _round_up(C, 128) * 4
        per_lane8 = 2 * 8 * _round_up(C, sub_x) * x_isz
        max_lanes = (avail - fixed8) // per_lane8
        hw_block = max(128, (max_lanes // 128) * 128)
    num_hw = _cdiv(HW, hw_block)
    if num_hw == 1:
        hw_block = HW
    need_mask = (num_hw > 1) and (HW % hw_block != 0)

    # ---- batch tile ----------------------------------------------------------
    per_row = (2 * _round_up(C, sub_x) * _round_up(hw_block, 128) * x_isz
               + 2 * N_pad * o_isz
               + _round_up(C, 128) * 4)
    bound_tb = max(8, (avail // per_row) // 8 * 8)
    tile_b = _choose_tile_b(B, bound_tb)
    num_b = _cdiv(B, tile_b)

    footprint = resident + tile_bytes(tile_b, hw_block)
    vmem_limit = min(cap, max(footprint + 2 * 1024 * 1024, 16 * 1024 * 1024))

    inv_hw = 1.0 / float(HW)

    # ---- kernel --------------------------------------------------------------
    def kernel(x_ref, w_ref, b_ref, o_ref, acc_ref):
        j = pl.program_id(1)

        @pl.when(j == 0)
        def _():
            acc_ref[...] = jnp.zeros_like(acc_ref)

        xb = x_ref[...].astype(jnp.float32)          # (tile_b, C, hw_block)
        if need_mask:
            lane = jax.lax.broadcasted_iota(jnp.int32, xb.shape, 2)
            xb = jnp.where(lane < (HW - j * hw_block), xb, 0.0)
        acc_ref[...] += jnp.sum(xb, axis=2)          # lane-axis (XLU) reduce

        @pl.when(j == pl.num_programs(1) - 1)
        def _():
            pooled = (acc_ref[...] * inv_hw).astype(w_ref.dtype)
            out = jnp.dot(pooled, w_ref[...],
                          preferred_element_type=jnp.float32)
            o_ref[...] = (out + b_ref[...].astype(jnp.float32)).astype(o_ref.dtype)

    cost = pl.CostEstimate(
        flops=int(B * C * HW + 2 * B * C * N_pad),
        transcendentals=0,
        bytes_accessed=int(B * C * HW * x_isz
                           + C * N_pad * x_isz + N_pad * x_isz
                           + B * N_pad * o_isz),
    )

    out = pl.pallas_call(
        kernel,
        out_shape=jax.ShapeDtypeStruct((B, N_pad), x.dtype),
        grid_spec=pltpu.PrefetchScalarGridSpec(
            num_scalar_prefetch=0,
            grid=(num_b, num_hw),
            in_specs=[
                # x: tiled over batch and spatial chunks (NCHW layout, no transpose).
                pl.BlockSpec((tile_b, C, hw_block), lambda i, j: (i, 0, j)),
                # weight / bias: constant blocks, single-buffered, VMEM-resident.
                pl.BlockSpec((C, N_pad), lambda i, j: (0, 0),
                             pipeline_mode=pl.Buffered(1)),
                pl.BlockSpec((1, N_pad), lambda i, j: (0, 0),
                             pipeline_mode=pl.Buffered(1)),
            ],
            out_specs=pl.BlockSpec((tile_b, N_pad), lambda i, j: (i, 0)),
            scratch_shapes=[pltpu.VMEM((tile_b, C), jnp.float32)],
        ),
        compiler_params=pltpu.CompilerParams(
            dimension_semantics=("parallel", "arbitrary"),
            vmem_limit_bytes=int(vmem_limit),
        ),
        cost_estimate=cost,
    )(x_flat, w_t, b2d)

    return out[:, :N]


if __name__ == "__main__":
    # Small deterministic setup consistent with the module's forward:
    # in_features = C = 4, n_classes = 8, batch = 2, spatial = 16x16.
    B, C, H, W, N_CLASSES = 2, 4, 16, 16, 8

    key = jax.random.PRNGKey(0)
    kx, kw, kb = jax.random.split(key, 3)

    x = jax.random.normal(kx, (B, C, H, W), dtype=jnp.float32)

    # PyTorch-style Linear init: uniform(-1/sqrt(C), 1/sqrt(C))
    bound = 1.0 / float(C) ** 0.5
    weight = jax.random.uniform(kw, (N_CLASSES, C), minval=-bound, maxval=bound,
                                dtype=jnp.float32)
    bias = jax.random.uniform(kb, (N_CLASSES,), minval=-bound, maxval=bound,
                              dtype=jnp.float32)

    out = jax.block_until_ready(resnet_decoder(x, weight, bias))

    # Pure-JAX reference: mean over spatial dims, then Linear.
    ref = jnp.mean(x, axis=(2, 3)) @ weight.T + bias
    assert out.shape == (B, N_CLASSES)
    assert jnp.allclose(out, ref, atol=1e-4, rtol=1e-4)

    print("KERNEL_OK")
</pallas_src>

<mosaic_0001>
module attributes {stable_mosaic.version = 11 : i64} {
  func.func @kernel(%arg0: i32, %arg1: i32, %arg2: memref<8x4x256xf32, #tpu.memory_space<vmem>>, %arg3: memref<4x128xf32, #tpu.memory_space<vmem>>, %arg4: memref<1x128xf32, #tpu.memory_space<vmem>>, %arg5: memref<8x128xf32, #tpu.memory_space<vmem>>, %arg6: memref<8x4xf32, #tpu.memory_space<vmem>>) attributes {dimension_semantics = [#tpu.dimension_semantics<parallel>, #tpu.dimension_semantics<arbitrary>], iteration_bounds = array<i64: 1, 1>, scalar_prefetch = 0 : i64, scratch_operands = 1 : i64, tpu.core_type = #tpu.core_type<tc>, window_params = [{transform_indices = @transform_0, window_bounds = array<i64: 8, 4, 256>}, {pipeline_mode = #tpu.pipeline_mode<synchronous>, transform_indices = @transform_1, window_bounds = array<i64: 4, 128>}, {pipeline_mode = #tpu.pipeline_mode<synchronous>, transform_indices = @transform_2, window_bounds = array<i64: 1, 128>}, {transform_indices = @transform_3, window_bounds = array<i64: 8, 128>}]} {
    %c0_i32 = arith.constant 0 : i32
    %0 = arith.cmpi eq, %arg1, %c0_i32 : i32
    %1 = arith.extui %0 : i1 to i32
    %c0_i32_0 = arith.constant 0 : i32
    %2 = arith.cmpi ne, %1, %c0_i32_0 : i32
    scf.if %2 {
      %cst_9 = arith.constant 0.000000e+00 : f32
      %11 = vector.broadcast %cst_9 : f32 to vector<8x4xf32>
      %c0_10 = arith.constant 0 : index
      %c0_11 = arith.constant 0 : index
      %12 = vector.load %arg6[%c0_10, %c0_11] : memref<8x4xf32, #tpu.memory_space<vmem>>, vector<8x4xf32>
      tpu.vector_store %arg6[%c0_10, %c0_11], %11 {strides = array<i32>} : memref<8x4xf32, #tpu.memory_space<vmem>>, vector<8x4xf32>,
    } else {
    }
    %c0 = arith.constant 0 : index
    %c0_1 = arith.constant 0 : index
    %c0_2 = arith.constant 0 : index
    %3 = vector.load %arg2[%c0, %c0_1, %c0_2] : memref<8x4x256xf32, #tpu.memory_space<vmem>>, vector<8x4x256xf32>
    %c0_3 = arith.constant 0 : index
    %c0_4 = arith.constant 0 : index
    %4 = vector.load %arg6[%c0_3, %c0_4] : memref<8x4xf32, #tpu.memory_space<vmem>>, vector<8x4xf32>
    %cst = arith.constant dense<0.000000e+00> : vector<8x4xf32>
    %5 = vector.multi_reduction <add>, %3, %cst [2] : vector<8x4x256xf32> to vector<8x4xf32>
    %6 = arith.addf %4, %5 : vector<8x4xf32>
    %c0_5 = arith.constant 0 : index
    %c0_6 = arith.constant 0 : index
    %7 = vector.load %arg6[%c0_5, %c0_6] : memref<8x4xf32, #tpu.memory_space<vmem>>, vector<8x4xf32>
    tpu.vector_store %arg6[%c0_5, %c0_6], %6 {strides = array<i32>} : memref<8x4xf32, #tpu.memory_space<vmem>>, vector<8x4xf32>,
    %c0_i32_7 = arith.constant 0 : i32
    %8 = arith.cmpi eq, %arg1, %c0_i32_7 : i32
    %9 = arith.extui %8 : i1 to i32
    %c0_i32_8 = arith.constant 0 : i32
    %10 = arith.cmpi ne, %9, %c0_i32_8 : i32
    scf.if %10 {
      %c0_9 = arith.constant 0 : index
      %c0_10 = arith.constant 0 : index
      %11 = vector.load %arg6[%c0_9, %c0_10] : memref<8x4xf32, #tpu.memory_space<vmem>>, vector<8x4xf32>
      %cst_11 = arith.constant 3.906250e-03 : f32
      %12 = vector.broadcast %cst_11 : f32 to vector<8x4xf32>
      %13 = arith.mulf %11, %12 : vector<8x4xf32>
      %c0_12 = arith.constant 0 : index
      %c0_13 = arith.constant 0 : index
      %14 = vector.load %arg3[%c0_12, %c0_13] : memref<4x128xf32, #tpu.memory_space<vmem>>, vector<4x128xf32>
      %cst_14 = arith.constant dense<0.000000e+00> : vector<8x128xf32>
      %15 = tpu.matmul %13, %14, %cst_14 {dimension_numbers = #tpu.dot_dimension_numbers<[1], [0], [0], [1], [0, 0, 1, 1], [], []>} : vector<8x4xf32>, vector<4x128xf32>, vector<8x128xf32> -> vector<8x128xf32>
      %c0_15 = arith.constant 0 : index
      %c0_16 = arith.constant 0 : index
      %16 = vector.load %arg4[%c0_15, %c0_16] : memref<1x128xf32, #tpu.memory_space<vmem>>, vector<1x128xf32>
      %17 = vector.broadcast %16 : vector<1x128xf32> to vector<8x128xf32>
      %18 = arith.addf %15, %17 : vector<8x128xf32>
      %c0_17 = arith.constant 0 : index
      %c0_18 = arith.constant 0 : index
      %19 = vector.load %arg5[%c0_17, %c0_18] : memref<8x128xf32, #tpu.memory_space<vmem>>, vector<8x128xf32>
      tpu.vector_store %arg5[%c0_17, %c0_18], %18 {strides = array<i32>} : memref<8x128xf32, #tpu.memory_space<vmem>>, vector<8x128xf32>,
    } else {
    }
    return
  }
  func.func @transform_0(%arg0: i32, %arg1: i32) -> (i32, i32, i32) {
    %c0_i32 = arith.constant 0 : i32
    %c0_i32_0 = arith.constant 0 : i32
    return %arg0, %c0_i32, %arg1 : i32, i32, i32
  }
  func.func @transform_1(%arg0: i32, %arg1: i32) -> (i32, i32) {
    %c0_i32 = arith.constant 0 : i32
    %c0_i32_0 = arith.constant 0 : i32
    %c0_i32_1 = arith.constant 0 : i32
    return %c0_i32, %c0_i32_0 : i32, i32
  }
  func.func @transform_2(%arg0: i32, %arg1: i32) -> (i32, i32) {
    %c0_i32 = arith.constant 0 : i32
    %c0_i32_0 = arith.constant 0 : i32
    %c0_i32_1 = arith.constant 0 : i32
    return %c0_i32, %c0_i32_0 : i32, i32
  }
  func.func @transform_3(%arg0: i32, %arg1: i32) -> (i32, i32) {
    %c0_i32 = arith.constant 0 : i32
    %c0_i32_0 = arith.constant 0 : i32
    return %arg0, %c0_i32 : i32, i32
  }
}

</mosaic_0001>

<bundles_post_ra>
// kernel: tpu_custom_call.1
= control target key start
LH: loop header
LB: loop body
LE: loop exit
PB: predicated region body
PF: predicated region fallthrough
CT: control target
= control target key end

     0   :  { %8 = vsyncpa [#allocation4], 0  ;;  %s443_s0 = inlined_call_operand.hbm [shape: f32[2,4,256], index: 0, kind: input, shape index: {}]   ;;  %s444_s1 = inlined_call_operand.hbm [shape: f32[4,128], index: 1, kind: input, shape index: {}]   ;;  %s445_s2 = inlined_call_operand.vmem [shape: f32[1,128], index: 2, kind: input, shape index: {}]   ;;  %s446_s3 = inlined_call_operand.hbm [shape: f32[2,128], index: 3, kind: output, shape index: {}]  }
   0x1   :  { %9 = vsyncpa [#allocation7], 0 }
   0x2   :  { %10 = vsyncpa [#allocation5], 0 }
   0x3   :  { %15 = vsyncadd [#allocation4], 768  ;;  %s382_s12 = smov [#allocation3]  }
   0x4   :  { %s16_s13 = sshll.u32 %s382_s12, 4  ;;  %s17_s13 = int_to_ptr.vmem [resolvable:$true] %s16_s13 }
   0x5   :  { %s324_s14 = scalar_lea.vmem %s17_s13, 256  ;;  %s328_s15 = scalar_lea.vmem %s17_s13, 1024 }
   0x6   :  { %p325_p0 = scmp.ne.s32.totalorder %s17_s13, %s324_s14  ;;  %p329_p1 = scmp.lt.s32.totalorder %s17_s13, %s17_s13 }
   0x7   :  { %p330_p2 = scmp.lt.s32.totalorder %s328_s15, %s324_s14 }
   0x9   :  { %p331_p3 = por %p330_p2, %p329_p1 }
   0xb   :  { %p332_p4 = pnand %p331_p3, %p325_p0 }
   0xd   :  { %335 = shalt.err (!%p332_p4)
}
   0xe   :  { %s383_s16 = smov 128   ;;  %s384_s17 = smov 8  }
   0xf   :  { %22 = dma.hbm_to_vmem [thread:$0]  %s443_s0, 256, %s17_s13, [#allocation4], %s383_s16, %s383_s16, %s384_s17  }
  0x10   :  { %s385_s20 = smov [#allocation6]  }
  0x11   :  { %s29_s21 = sshll.u32 %s385_s20, 4  ;;  %s30_s21 = int_to_ptr.vmem [resolvable:$true] %s29_s21 }
  0x12   :  { %s344_s22 = scalar_lea.vmem %s30_s21, 64  ;;  %p349_p6 = scmp.lt.s32.totalorder %s30_s21, %s30_s21 }
  0x13   :  { %p345_p5 = scmp.ne.s32.totalorder %s30_s21, %s344_s22  ;;  %p350_p7 = scmp.lt.s32.totalorder %s344_s22, %s344_s22 }
  0x15   :  { %p351_p8 = por %p350_p7, %p349_p6 }
  0x17   :  { %p352_p9 = pnand %p351_p8, %p345_p5 }
  0x19   :  { %355 = shalt.err (!%p352_p9)
}
  0x1a   :  { %32 = dma.hbm_to_vmem [thread:$0]  %s444_s1, 64, %s30_s21, [#allocation7]  }
  0x1b   :  { %376 = dma.done.wait [#allocation4], 1024  }
  0x1c   :  { %377 = vsyncadd [#allocation4], 4294966272 }
  0x1d   :  { %378 = dma.done.wait [#allocation7], 64  }
  0x1e   :  { %379 = vsyncadd [#allocation7], 4294967232  ;;  %vm80_vm0 = vcmask 1043456   ;;  %v47_v0 = vld [vmem:[#allocation3] sm:$0xff]  ;;  %v49_v1 = vld [vmem:[#allocation3 + $0x10] sm:$0xff]  ;;  %vm45_vm1 = vcmask 31744   ;;  %v129_v42 = vlaneseq }
  0x1f   :  { %v48_v2 = vld [vmem:[#allocation3 + $0x8] sm:$0xff]  ;;  %v64_v3 = vcombine.high %v47_v0, %v47_v0  ;;  %v81_v4 = vsel %vm80_vm0, %v47_v0, 0.0  ;;  %v66_v5 = vcombine.high %v49_v1, %v49_v1  ;;  %v91_v6 = vsel %vm80_vm0, %v49_v1, 0.0  ;;  %v50_v7 = vld [vmem:[#allocation3 + $0x18] sm:$0xff]  ;;  %v51_v8 = vld [vmem:[#allocation3 + $0x20] sm:$0xff] }
  0x20   :  { %v65_v9 = vcombine.high %v48_v2, %v48_v2  ;;  %v86_v10 = vsel %vm80_vm0, %v48_v2, 0.0  ;;  %v67_v11 = vcombine.high %v50_v7, %v50_v7  ;;  %v52_v12 = vld [vmem:[#allocation3 + $0x28] sm:$0xff]  ;;  %v96_v15 = vsel %vm80_vm0, %v50_v7, 0.0  ;;  %v53_v21 = vld [vmem:[#allocation3 + $0x30] sm:$0xff]  ;;  %v54_v22 = vld [vmem:[#allocation3 + $0x38] sm:$0xff] }
  0x21   :  { %v82_v13 = vsel %vm80_vm0, %v64_v3, 0.0  ;;  %v92_v14 = vsel %vm80_vm0, %v66_v5, 0.0  ;;  %v68_v16 = vcombine.high %v51_v8, %v51_v8  ;;  %v69_v23 = vcombine.high %v52_v12, %v52_v12  ;;  %v186_v41 = vld [vmem:[#allocation6] sm:$0xf] }
  0x22   :  { %v83_v17 = vadd.f32 %v82_v13, %v81_v4  ;;  %v93_v18 = vadd.f32 %v92_v14, %v91_v6  ;;  %v87_v19 = vsel %vm80_vm0, %v65_v9, 0.0  ;;  %v97_v20 = vsel %vm80_vm0, %v67_v11, 0.0  ;;  %v289_v9 = vld [vmem:[%s445_s2] ss:$0 sm:$0xff] }
  0x23   :  { %v88_v24 = vadd.f32 %v87_v19, %v86_v10  ;;  %v98_v25 = vadd.f32 %v97_v20, %v96_v15  ;;  %v101_v26 = vsel %vm80_vm0, %v51_v8, 0.0  ;;  %v102_v27 = vsel %vm80_vm0, %v68_v16, 0.0 }
  0x24   :  { %84 = vadd.xlane.f32.xlu0 %v83_v17  ;;  %94 = vadd.xlane.f32.xlu1 %v93_v18  ;;  %v106_v28 = vsel %vm80_vm0, %v52_v12, 0.0  ;;  %v107_v29 = vsel %vm80_vm0, %v69_v23, 0.0  ;;  %v70_v30 = vcombine.high %v53_v21, %v53_v21  ;;  %v71_v31 = vcombine.high %v54_v22, %v54_v22 }
  0x25   :  { %v103_v32 = vadd.f32 %v102_v27, %v101_v26  ;;  %v108_v33 = vadd.f32 %v107_v29, %v106_v28  ;;  %v111_v34 = vsel %vm80_vm0, %v53_v21, 0.0  ;;  %v116_v36 = vsel %vm80_vm0, %v54_v22, 0.0 }
  0x26   :  { %v112_v35 = vsel %vm80_vm0, %v70_v30, 0.0  ;;  %v117_v37 = vsel %vm80_vm0, %v71_v31, 0.0  ;;  %v386_v40 = vmov 0.0   ;;  %vm387_vm2 = vmmov 0  }
  0x27   :  { %v113_v38 = vadd.f32 %v112_v35, %v111_v34  ;;  %v118_v39 = vadd.f32 %v117_v37, %v116_v36  ;;  %294 = vmatprep.subr.mxu0 %v386_v40  ;;  %46 = vst.msk [vmem:[#allocation2] sm:$0xff] %vm45_vm1, %v386_v40  ;;  %296 = vmatprep.mubr.msk.f32.mxu0 %vm387_vm2, %v386_v40  ;;  %v130_v43 = vand.u32 127, %v129_v42  ;;  %v132_v44 = vshrl.u32 %v129_v42, 7 }
  0x28   :  { %89 = vadd.xlane.f32.xlu0 %v88_v24  ;;  %99 = vadd.xlane.f32.xlu1 %v98_v25  ;;  %vm163_vm3 = vcmask 1041409   ;;  %vm165_vm4 = vcmask 1042434   ;;  %vm167_vm5 = vcmask 1043459   ;;  %vm169_vm6 = vcmask 1044484  }
  0x29   :  { %295 = vmatpush3.msk.msra.mxu0 %vm80_vm0, %v186_v41  ;;  %v133_v47 = vsub.s32 %v130_v43, %v132_v44  ;;  %vm171_vm7 = vcmask 1045509   ;;  %vm173_vm8 = vcmask 1046534   ;;  %vm175_vm9 = vcmask 1047559  }
  0x2c   :  { %104 = vadd.xlane.f32.xlu0 %v103_v32  ;;  %109 = vadd.xlane.f32.xlu1 %v108_v33 }
  0x2e   :  { %v55_v3 = vld [vmem:[#allocation2] sm:$0xff] }
  0x30   :  { %114 = vadd.xlane.f32.xlu0 %v113_v38  ;;  %119 = vadd.xlane.f32.xlu1 %v118_v39 }
  0xad   :  { %v85_v45 = vpop.xlane.xlu0 %84  ;;  %v95_v46 = vpop.xlane.xlu1 %94 }
  0xae   :  { %v134_v50 = vrot.slane %v85_v45, %v133_v47  ;;  %v142_v53 = vrot.slane %v95_v46, %v133_v47 }
  0xb1   :  { %v90_v48 = vpop.xlane.xlu0 %89  ;;  %v100_v49 = vpop.xlane.xlu1 %99 }
  0xb2   :  { %v138_v51 = vrot.slane %v90_v48, %v133_v47  ;;  %v146_v52 = vrot.slane %v100_v49, %v133_v47 }
  0xb4   :  { %v164_v54 = vsel %vm163_vm3, %v138_v51, %v134_v50 }
  0xb5   :  { %v166_v55 = vsel %vm165_vm4, %v142_v53, %v164_v54  ;;  %v105_v56 = vpop.xlane.xlu0 %104  ;;  %v110_v57 = vpop.xlane.xlu1 %109 }
  0xb6   :  { %v168_v58 = vsel %vm167_vm5, %v146_v52, %v166_v55  ;;  %v150_v59 = vrot.slane %v105_v56, %v133_v47  ;;  %v154_v60 = vrot.slane %v110_v57, %v133_v47 }
  0xb8   :  { %v170_v61 = vsel %vm169_vm6, %v150_v59, %v168_v58 }
  0xb9   :  { %v115_v62 = vpop.xlane.xlu0 %114  ;;  %v120_v63 = vpop.xlane.xlu1 %119  ;;  %v172_v2 = vsel %vm171_vm7, %v154_v60, %v170_v61 }
  0xba   :  { %v158_v0 = vrot.slane %v115_v62, %v133_v47  ;;  %v162_v1 = vrot.slane %v120_v63, %v133_v47 }
  0xbc   :  { %v174_v4 = vsel %vm173_vm8, %v158_v0, %v172_v2 }
  0xbd   :  { %v176_v5 = vsel %vm175_vm9, %v162_v1, %v174_v4 }
  0xbe   :  { %v178_v6 = vadd.f32 %v176_v5, %v55_v3 }
  0xc0   :  { %180 = vst.msk [vmem:[#allocation2] sm:$0xff] %vm45_vm1, %v178_v6 }
  0xc7   :  { %v184_v7 = vld [vmem:[#allocation2] sm:$0xff] }
  0xc8   :  { %v185_v8 = vmul.f32 0.00390625, %v184_v7 }
  0xca   :  { %297 = vmatmul.mubr.msk.f32.vlgmr.msra.gmra.mxu0 %vm45_vm1, %v185_v8 }
 0x18a   :  { %v266_v10 = vpop.f32.mrf.mxu0 }
 0x18b   :  { %v267_v11 = vadd.f32 %v289_v9, %v266_v10 }
 0x18c   :  { %v298_v12 = vpop.f32.mrf.mxu0 }
 0x18d   :  { %270 = vst [vmem:[#allocation8] sm:$0xff] %v267_v11 }
 0x18e   :  { %275 = vsyncadd [#allocation5], 96  ;;  %s388_s25 = smov [#allocation8]  }
 0x18f   :  { %s276_s26 = sshll.u32 %s388_s25, 4  ;;  %s277_s26 = int_to_ptr.vmem [resolvable:$true] %s276_s26 }
 0x190   :  { %s356_s27 = scalar_lea.vmem %s277_s26, 32  ;;  %s360_s28 = scalar_lea.vmem %s277_s26, 128 }
 0x191   :  { %p357_p10 = scmp.ne.s32.totalorder %s277_s26, %s356_s27  ;;  %p361_p11 = scmp.lt.s32.totalorder %s277_s26, %s277_s26 }
 0x192   :  { %p362_p12 = scmp.lt.s32.totalorder %s360_s28, %s356_s27 }
 0x194   :  { %p363_p13 = por %p362_p12, %p361_p11 }
 0x196   :  { %p364_p0 = pnand %p363_p13, %p357_p10 }
 0x198   :  { %367 = shalt.err (!%p364_p0)
}
 0x199   :  { %s389_s29 = smov 32   ;;  %s390_s30 = smov 2  }
 0x19a   :  { %282 = dma.vmem_to_hbm [thread:$0]  %s277_s26, 32, %s446_s3, [#allocation5], %s389_s29, %s389_s29, %s390_s30  }
 0x19b   :  { %380 = dma.done.wait [#allocation5], 128  }
 0x19c   :  { %381 = vsyncadd [#allocation5], 4294967168 }
 0x19d   :  { %286 = vsyncpa [#allocation4], 1 }
 0x19e   :  { %287 = vsyncpa [#allocation7], 1 }
 0x19f   :  { %288 = vsyncpa [#allocation5], 1 }

</bundles_post_ra>
